<compile_context>
chip_gen: v5e
topology: v5e:2x2
jax: 0.10.0
libtpu: 0.0.40
codegen_flags: <defaults>
</compile_context>

<pallas_src>
import jax
import jax.numpy as jnp
from jax.experimental import pallas as pl
from jax.experimental.pallas import tpu as pltpu

DECAY = 0.2          # module-level `decay`
THRESH = 0.3         # self.thresh
BETA_ADAPT = 0.07    # self.beta (adaptation gain; distinct from BN beta)
BN_EPS = 1e-5
BN_MOMENTUM = 0.1    # PyTorch BatchNorm2d default

MATMUL_DTYPE = jnp.bfloat16      # MXU feed dtype (f32 accumulation)
SPIKE_DTYPE = jnp.bfloat16       # spikes are exactly 0/1 -> exact in bf16


def _select_vmem_budgets():
    """(vmem_limit_bytes, per-tile working-set budget), per TPU generation."""
    try:
        info = pltpu.get_tpu_info()
        cap = getattr(info, "vmem_capacity_bytes", None)
    except Exception:
        cap = None
    if cap is not None and cap >= 100 * 1024 * 1024:     # v5e / v6e: 128 MiB VMEM
        return 96 * 1024 * 1024, 64 * 1024 * 1024
    return 32 * 1024 * 1024, 24 * 1024 * 1024            # v7x-safe (64 MiB VMEM)


VMEM_LIMIT_BYTES, VMEM_TILE_BUDGET = _select_vmem_budgets()


# --------------------------------------------------------------------------- helpers
def _ceil_to(n, m):
    return ((n + m - 1) // m) * m


def _row_tile(hwp, bytes_per_col, n_batch):
    """Largest multiple-of-128 divisor of hwp whose double-buffered working set fits
    the VMEM tile budget; prefers a tiling with >= 2 total grid steps (pipelining /
    v7x dual-TC)."""
    cap = max(128, VMEM_TILE_BUDGET // max(2 * bytes_per_col, 1))
    cands = [t for t in range(128, hwp + 1, 128) if hwp % t == 0 and t <= cap]
    if not cands:
        cands = [128]                                     # 128 always divides hwp
    pipelined = [t for t in cands if n_batch * (hwp // t) >= 2]
    return max(pipelined) if pipelined else max(cands)


def _cparams(semantics):
    return pltpu.CompilerParams(dimension_semantics=semantics,
                                vmem_limit_bytes=VMEM_LIMIT_BYTES)


def _row_spec(cout, rt):
    return pl.BlockSpec((1, cout, rt), lambda n, hw: (n, 0, hw))


def _bcast_spec(shape):
    return pl.BlockSpec(shape, lambda n, hw: (0,) * len(shape))


def _im2col(x_nchw, KH, KW, padding, hwp, dtype=MATMUL_DTYPE):
    """(N,Cin,H,W) -> im2col patches (N, K, hwp), K = Cin*KH*KW, lane axis = H*W
    (padded with zero columns up to hwp).  K-ordering matches
    conv_w.reshape(Cout, Cin*KH*KW).  Assumes stride=1, dilation=1."""
    # TODO(synk): stride/dilation other than the module defaults are not supported.
    N, Cin, H, W = x_nchw.shape
    x = x_nchw.astype(dtype)                              # cast BEFORE 9x expansion
    xp = jnp.pad(x, ((0, 0), (0, 0), (padding, padding), (padding, padding)))
    taps = [xp[:, :, ky:ky + H, kx:kx + W]
            for ky in range(KH) for kx in range(KW)]      # each (N, Cin, H, W)
    p = jnp.stack(taps, axis=2)                           # (N, Cin, KH*KW, H, W)
    p = p.reshape(N, Cin * KH * KW, H * W)
    if hwp != H * W:
        p = jnp.pad(p, ((0, 0), (0, 0), (0, hwp - H * W)))
    return p


# --------------------------------------------------------------------------- kernels
def _lif_update(mem_this, rhofac, mem_prev, a_prev):
    """Adaptive-LIF dynamics on (Cout, rt) f32 tiles (lane axis = spatial rows)."""
    v_th = THRESH + BETA_ADAPT * a_prev            # A = thresh + beta * a
    mem = mem_prev + mem_this
    spike = (mem > v_th).astype(jnp.float32)       # ActFun_lsnn.forward
    mem_new = mem * (DECAY * (1.0 - spike))
    a_new = rhofac * a_prev - spike                # exp(-1/rho)*a - spike
    return spike, mem_new, a_new


def _conv_kernel(patches_ref, w_ref, b_ref, out_ref):
    # (Cout,K) @ (K,rt) -> (Cout,rt), lane-dense over spatial positions.
    conv = jnp.dot(w_ref[...], patches_ref[0],
                   preferred_element_type=jnp.float32) + b_ref[...]
    out_ref[0] = conv.astype(out_ref.dtype)


def _conv_stats_kernel(patches_ref, w_ref, b_ref, conv_ref, sum_ref, sq_ref):
    conv = jnp.dot(w_ref[...], patches_ref[0],
                   preferred_element_type=jnp.float32) + b_ref[...]
    conv_ref[0] = conv.astype(conv_ref.dtype)      # bf16 (spiking) / f32 (mixed)

    @pl.when(pl.program_id(1) == 0)                # first HW tile of this batch elem
    def _():
        sum_ref[...] = jnp.zeros_like(sum_ref)
        sq_ref[...] = jnp.zeros_like(sq_ref)

    # f32 partial sums per batch element; padded columns (conv == bias exactly)
    # are corrected analytically in the wrapper.
    sum_ref[...] += jnp.sum(conv, axis=1, keepdims=True)[None]
    sq_ref[...] += jnp.sum(conv * conv, axis=1, keepdims=True)[None]


def _affine_lif_kernel(conv_ref, scale_ref, shift_ref, rhofac_ref, mem_ref, a_ref,
                       spike_ref, memout_ref, aout_ref):
    mem_this = scale_ref[...] * conv_ref[0].astype(jnp.float32) + shift_ref[...]
    spike, mem_new, a_new = _lif_update(mem_this, rhofac_ref[...],
                                        mem_ref[0], a_ref[0])
    spike_ref[0] = spike.astype(spike_ref.dtype)
    memout_ref[0] = mem_new
    aout_ref[0] = a_new


def _conv_lif_kernel(patches_ref, w_ref, b_ref, rhofac_ref, mem_ref, a_ref,
                     spike_ref, memout_ref, aout_ref):
    mem_this = jnp.dot(w_ref[...], patches_ref[0],
                       preferred_element_type=jnp.float32) + b_ref[...]
    spike, mem_new, a_new = _lif_update(mem_this, rhofac_ref[...],
                                        mem_ref[0], a_ref[0])
    spike_ref[0] = spike.astype(spike_ref.dtype)
    memout_ref[0] = mem_new
    aout_ref[0] = a_new


# ---------------------------------------------------------------- pallas_call wrappers
def _conv_pass(patches, w_ck, bias_c1, *, with_stats, conv_dtype=jnp.float32):
    N, K, HWp = patches.shape
    Cout = w_ck.shape[0]
    conv_b = jnp.dtype(conv_dtype).itemsize
    rt = _row_tile(HWp, K * patches.dtype.itemsize + Cout * conv_b, N)
    grid = (N, HWp // rt)
    pat = pl.BlockSpec((1, K, rt), lambda n, hw: (n, 0, hw))
    row = _row_spec(Cout, rt)
    in_specs = [pat, _bcast_spec((Cout, K)), _bcast_spec((Cout, 1))]
    conv_shape = jax.ShapeDtypeStruct((N, Cout, HWp), conv_dtype)
    if with_stats:
        stat_spec = pl.BlockSpec((1, Cout, 1), lambda n, hw: (n, 0, 0))
        stat_shape = jax.ShapeDtypeStruct((N, Cout, 1), jnp.float32)
        return pl.pallas_call(
            _conv_stats_kernel, grid=grid, in_specs=in_specs,
            out_specs=(row, stat_spec, stat_spec),
            out_shape=(conv_shape, stat_shape, stat_shape),
            # n axis parallel (v7x dual-TC shards it); stats revisit only across hw.
            compiler_params=_cparams(("parallel", "arbitrary")),
        )(patches, w_ck, bias_c1)
    return pl.pallas_call(
        _conv_kernel, grid=grid, in_specs=in_specs,
        out_specs=row, out_shape=conv_shape,
        compiler_params=_cparams(("parallel", "parallel")),
    )(patches, w_ck, bias_c1)


def _affine_lif_pass(conv, scale_c1, shift_c1, rhofac_c1, mem, a):
    N, Cout, HWp = conv.shape
    bpc = Cout * (conv.dtype.itemsize + 4 + 4 + 2 + 4 + 4)   # conv, mem, a, outputs
    rt = _row_tile(HWp, bpc, N)
    grid = (N, HWp // rt)
    row = _row_spec(Cout, rt)
    f32s = jax.ShapeDtypeStruct((N, Cout, HWp), jnp.float32)
    spks = jax.ShapeDtypeStruct((N, Cout, HWp), SPIKE_DTYPE)
    return pl.pallas_call(
        _affine_lif_kernel, grid=grid,
        in_specs=[row, _bcast_spec((Cout, 1)), _bcast_spec((Cout, 1)),
                  _bcast_spec((Cout, 1)), row, row],
        out_specs=(row, row, row),
        out_shape=(spks, f32s, f32s),
        input_output_aliases={4: 1, 5: 2},             # mem->mem_new, a->a_new
        compiler_params=_cparams(("parallel", "parallel")),
    )(conv, scale_c1, shift_c1, rhofac_c1, mem, a)


def _conv_lif_pass(patches, w_ck, bias_c1, rhofac_c1, mem, a):
    N, K, HWp = patches.shape
    Cout = w_ck.shape[0]
    bpc = K * patches.dtype.itemsize + Cout * (4 + 4 + 2 + 4 + 4)
    rt = _row_tile(HWp, bpc, N)
    grid = (N, HWp // rt)
    pat = pl.BlockSpec((1, K, rt), lambda n, hw: (n, 0, hw))
    row = _row_spec(Cout, rt)
    f32s = jax.ShapeDtypeStruct((N, Cout, HWp), jnp.float32)
    spks = jax.ShapeDtypeStruct((N, Cout, HWp), SPIKE_DTYPE)
    return pl.pallas_call(
        _conv_lif_kernel, grid=grid,
        in_specs=[pat, _bcast_spec((Cout, K)), _bcast_spec((Cout, 1)),
                  _bcast_spec((Cout, 1)), row, row],
        out_specs=(row, row, row),
        out_shape=(spks, f32s, f32s),
        input_output_aliases={4: 1, 5: 2},             # mem->mem_new, a->a_new
        compiler_params=_cparams(("parallel", "parallel")),
    )(patches, w_ck, bias_c1, rhofac_c1, mem, a)


# ------------------------------------------------------------------------- step / forward
def _snn_step_impl(x_nchw, params, mem, a, bn_training, mixed_at_mem, padding):
    w = params["conv_w"].astype(jnp.float32)
    Cout, Cin, KH, KW = w.shape
    N, _, H, W = x_nchw.shape
    HW = H * W
    HWp = _ceil_to(HW, 128)
    R = N * HW

    gamma = params["bn_gamma"].astype(jnp.float32)
    beta = params["bn_beta"].astype(jnp.float32)
    rmean = params["bn_rmean"].astype(jnp.float32)
    rvar = params["bn_rvar"].astype(jnp.float32)
    bias = params["conv_b"].astype(jnp.float32)

    # TODO(synk): at the model level the im2col would be hoisted out of the
    # per-timestep loop / replaced by an in-kernel halo conv; redone per call here
    # because the public interface is NCHW per step.
    patches = _im2col(x_nchw, KH, KW, padding, HWp)        # (N, K, HWp) bf16

    col = lambda v: v.reshape(Cout, 1).astype(jnp.float32)
    # rho.data.clamp_(0.64, 1.1); value never changes afterwards in forward.
    rho = jnp.clip(params["rho"].reshape(-1), 0.64, 1.1)
    rhofac = jnp.exp(-1.0 / rho).reshape(Cout, 1).astype(jnp.float32)

    if not bn_training:
        # eval: fuse_conv_bn_eval — fold BN into conv weights/bias (tiny wrapper op).
        inv_std = jax.lax.rsqrt(rvar + BN_EPS)
        w_f = (w * (gamma * inv_std)[:, None, None, None]).reshape(Cout, Cin * KH * KW)
        w_f = w_f.astype(MATMUL_DTYPE)
        b_f = beta + (bias - rmean) * gamma * inv_std
        if mixed_at_mem:
            mem_this = _conv_pass(patches, w_f, col(b_f), with_stats=False,
                                  conv_dtype=jnp.float32)
            return {"mem_this": mem_this}
        spike, mem_new, a_new = _conv_lif_pass(patches, w_f, col(b_f), rhofac, mem, a)
        return {"spike": spike, "mem": mem_new, "a": a_new}

    # training BN: pass 1 = conv + per-(n,channel) sum / sumsq partials.
    w_ck = w.reshape(Cout, Cin * KH * KW).astype(MATMUL_DTYPE)
    conv_dtype = jnp.float32 if mixed_at_mem else MATMUL_DTYPE
    conv, s_nc1, ss_nc1 = _conv_pass(patches, w_ck, col(bias), with_stats=True,
                                     conv_dtype=conv_dtype)

    # Tiny cross-N reduction + exact correction for the zero lane-pad columns
    # (those columns have conv == bias exactly).
    n_pad = N * (HWp - HW)
    sum_c = jnp.sum(s_nc1, axis=0).reshape(-1) - n_pad * bias
    sq_c = jnp.sum(ss_nc1, axis=0).reshape(-1) - n_pad * bias * bias
    mu = sum_c / R
    # TODO(synk): E[x^2]-E[x]^2 in f32 can cancel for large means / huge R; a
    # Welford-style per-tile accumulator would be more robust if that bites.
    var = jnp.maximum(sq_c / R - mu * mu, 0.0)             # biased var (normalize)
    scale = (gamma * jax.lax.rsqrt(var + BN_EPS)).reshape(Cout, 1)
    shift = beta.reshape(Cout, 1) - scale * mu.reshape(Cout, 1)
    # PyTorch running-stat update (momentum=0.1, unbiased var for running_var).
    var_unb = var * (R / max(R - 1, 1))
    new_rmean = (1.0 - BN_MOMENTUM) * rmean + BN_MOMENTUM * mu
    new_rvar = (1.0 - BN_MOMENTUM) * rvar + BN_MOMENTUM * var_unb

    if mixed_at_mem:
        # BN affine done in the wrapper (XLA fuses it) — no extra Pallas pass.
        mem_this = scale.reshape(1, Cout, 1) * conv + shift.reshape(1, Cout, 1)
        return {"mem_this": mem_this, "bn_rmean": new_rmean, "bn_rvar": new_rvar}

    # pass 2 = fused BN-affine + adaptive-LIF update (conv intermediate is bf16).
    spike, mem_new, a_new = _affine_lif_pass(conv, scale, shift, rhofac, mem, a)
    return {"spike": spike, "mem": mem_new, "a": a_new,
            "bn_rmean": new_rmean, "bn_rvar": new_rvar}


_snn_step = jax.jit(_snn_step_impl, static_argnums=(4, 5, 6))


def snn_2d_lsnn_forward(x_nchw, params, state, run_param, *, bn_training=True):
    """Mirrors SNN_2d_lsnn.forward(input, param).

    Returns (output_NCHW, new_state).  new_state keeps 'mem'/'a' in the kernel's
    (N, Cout, ceil(H*W/128)*128) layout across timesteps, plus (training only) the
    updated BN running stats 'bn_rmean'/'bn_rvar'.  Spikes are returned in bf16
    (values are exactly 0/1); mem_this is f32."""
    N, Cin, H, W = x_nchw.shape
    Cout = params["conv_w"].shape[0]
    HW = H * W
    HWp = _ceil_to(HW, 128)

    mixed = bool(run_param["mixed_at_mem"])
    has_state = isinstance(state, dict) and ("mem" in state)
    if run_param["is_first"] or not has_state:
        mem = jnp.zeros((N, Cout, HWp), jnp.float32)
        a = jnp.zeros((N, Cout, HWp), jnp.float32)
    else:
        mem, a = state["mem"], state["a"]

    out = _snn_step(x_nchw, params, mem, a, bool(bn_training), mixed, 1)

    def to_nchw(v):
        # Kernel layout is already (N, Cout, HWp): slice + reshape (no transpose;
        # free when H*W is a multiple of 128).
        return v[:, :, :HW].reshape(N, Cout, H, W)

    if mixed:
        # PyTorch returns mem_this before touching the LIF state.
        new_state = dict(state) if isinstance(state, dict) else {}
        for k in ("bn_rmean", "bn_rvar"):
            if k in out:
                new_state[k] = out[k]
        return to_nchw(out["mem_this"]), new_state

    new_state = {"mem": out["mem"], "a": out["a"]}
    for k in ("bn_rmean", "bn_rvar"):
        if k in out:
            new_state[k] = out[k]
    return to_nchw(out["spike"]), new_state


def init_params(key, input_c, output_c, kernel_size=3):
    """Deterministic synthetic parameters (PyTorch-default-style uniform init)."""
    k1, k2 = jax.random.split(key)
    fan_in = input_c * kernel_size * kernel_size
    bound = 1.0 / (fan_in ** 0.5)
    return {
        "conv_w": jax.random.uniform(
            k1, (output_c, input_c, kernel_size, kernel_size),
            jnp.float32, -bound, bound),
        "conv_b": jax.random.uniform(k2, (output_c,), jnp.float32, -bound, bound),
        "bn_gamma": jnp.ones((output_c,), jnp.float32),
        "bn_beta": jnp.zeros((output_c,), jnp.float32),
        "bn_rmean": jnp.zeros((output_c,), jnp.float32),
        "bn_rvar": jnp.ones((output_c,), jnp.float32),
        "rho": 0.87 * jnp.ones((output_c, 1, 1), jnp.float32),
    }


if __name__ == "__main__":
    key = jax.random.PRNGKey(0)
    kx, kp = jax.random.split(key)

    N, C_IN, C_OUT, H, W = 2, 4, 8, 16, 16
    x = jax.random.normal(kx, (N, C_IN, H, W), jnp.float32)
    params = init_params(kp, C_IN, C_OUT)

    # training mode, timestep 1 (state reset), spiking output
    spike1, state = snn_2d_lsnn_forward(
        x, params, None, {"is_first": True, "mixed_at_mem": False}, bn_training=True)
    # training mode, timestep 2 (state carried forward)
    spike2, state = snn_2d_lsnn_forward(
        x, params, state, {"is_first": False, "mixed_at_mem": False}, bn_training=True)
    # training mode, mixed_at_mem: returns conv+BN output, state untouched
    mem_this, _ = snn_2d_lsnn_forward(
        x, params, state, {"is_first": False, "mixed_at_mem": True}, bn_training=True)
    # eval mode (BN folded into conv), spiking and mixed paths
    spike_eval, _ = snn_2d_lsnn_forward(
        x, params, None, {"is_first": True, "mixed_at_mem": False}, bn_training=False)
    memthis_eval, _ = snn_2d_lsnn_forward(
        x, params, None, {"is_first": False, "mixed_at_mem": True}, bn_training=False)

    jax.block_until_ready((spike1, spike2, mem_this, spike_eval, memthis_eval))
    assert spike1.shape == (N, C_OUT, H, W)
    assert spike2.shape == (N, C_OUT, H, W)
    assert mem_this.shape == (N, C_OUT, H, W)
    assert spike_eval.shape == (N, C_OUT, H, W)
    assert memthis_eval.shape == (N, C_OUT, H, W)
    assert bool(jnp.all((spike1 == 0.0) | (spike1 == 1.0)))
    assert bool(jnp.all((spike2 == 0.0) | (spike2 == 1.0)))
    assert bool(jnp.all((spike_eval == 0.0) | (spike_eval == 1.0)))
    print("KERNEL_OK")
</pallas_src>

<mosaic_0001>
module attributes {stable_mosaic.version = 11 : i64} {
  func.func @_conv_stats_kernel(%arg0: i32, %arg1: i32, %arg2: memref<1x36x256xbf16, #tpu.memory_space<vmem>>, %arg3: memref<8x36xbf16, #tpu.memory_space<vmem>>, %arg4: memref<8x1xf32, #tpu.memory_space<vmem>>, %arg5: memref<1x8x256xbf16, #tpu.memory_space<vmem>>, %arg6: memref<1x8x1xf32, #tpu.memory_space<vmem>>, %arg7: memref<1x8x1xf32, #tpu.memory_space<vmem>>) attributes {dimension_semantics = [#tpu.dimension_semantics<parallel>, #tpu.dimension_semantics<arbitrary>], iteration_bounds = array<i64: 2, 1>, scalar_prefetch = 0 : i64, scratch_operands = 0 : i64, tpu.core_type = #tpu.core_type<tc>, window_params = [{transform_indices = @transform_0, window_bounds = array<i64: 1, 36, 256>}, {pipeline_mode = #tpu.pipeline_mode<synchronous>, transform_indices = @transform_1, window_bounds = array<i64: 8, 36>}, {pipeline_mode = #tpu.pipeline_mode<synchronous>, transform_indices = @transform_2, window_bounds = array<i64: 8, 1>}, {transform_indices = @transform_3, window_bounds = array<i64: 1, 8, 256>}, {transform_indices = @transform_4, window_bounds = array<i64: 1, 8, 1>}, {transform_indices = @transform_5, window_bounds = array<i64: 1, 8, 1>}]} {
    %c0 = arith.constant 0 : index
    %c0_0 = arith.constant 0 : index
    %0 = vector.load %arg3[%c0, %c0_0] : memref<8x36xbf16, #tpu.memory_space<vmem>>, vector<8x36xbf16>
    %c0_1 = arith.constant 0 : index
    %c0_2 = arith.constant 0 : index
    %c0_3 = arith.constant 0 : index
    %1 = vector.load %arg2[%c0_1, %c0_2, %c0_3] : memref<1x36x256xbf16, #tpu.memory_space<vmem>>, vector<1x36x256xbf16>
    %2 = vector.shape_cast %1 : vector<1x36x256xbf16> to vector<36x256xbf16>
    %cst = arith.constant dense<0.000000e+00> : vector<8x256xf32>
    %3 = tpu.matmul %0, %2, %cst {dimension_numbers = #tpu.dot_dimension_numbers<[1], [0], [0], [1], [0, 0, 1, 1], [], []>} : vector<8x36xbf16>, vector<36x256xbf16>, vector<8x256xf32> -> vector<8x256xf32>
    %c0_4 = arith.constant 0 : index
    %c0_5 = arith.constant 0 : index
    %4 = vector.load %arg4[%c0_4, %c0_5] : memref<8x1xf32, #tpu.memory_space<vmem>>, vector<8x1xf32>
    %5 = vector.broadcast %4 : vector<8x1xf32> to vector<8x256xf32>
    %6 = arith.addf %3, %5 : vector<8x256xf32>
    %7 = arith.truncf %6 : vector<8x256xf32> to vector<8x256xbf16>
    %c0_6 = arith.constant 0 : index
    %c0_7 = arith.constant 0 : index
    %c0_8 = arith.constant 0 : index
    %8 = vector.load %arg5[%c0_6, %c0_7, %c0_8] : memref<1x8x256xbf16, #tpu.memory_space<vmem>>, vector<1x8x256xbf16>
    %9 = vector.shape_cast %8 : vector<1x8x256xbf16> to vector<8x256xbf16>
    %10 = vector.shape_cast %7 : vector<8x256xbf16> to vector<1x8x256xbf16>
    tpu.vector_store %arg5[%c0_6, %c0_7, %c0_8], %10 {strides = array<i32>} : memref<1x8x256xbf16, #tpu.memory_space<vmem>>, vector<1x8x256xbf16>,
    %c0_i32 = arith.constant 0 : i32
    %11 = arith.cmpi eq, %arg1, %c0_i32 : i32
    %12 = arith.extui %11 : i1 to i32
    %c0_i32_9 = arith.constant 0 : i32
    %13 = arith.cmpi ne, %12, %c0_i32_9 : i32
    scf.if %13 {
      %cst_24 = arith.constant 0.000000e+00 : f32
      %27 = vector.broadcast %cst_24 : f32 to vector<1x8x1xf32>
      %c0_25 = arith.constant 0 : index
      %c0_26 = arith.constant 0 : index
      %c0_27 = arith.constant 0 : index
      %28 = vector.load %arg6[%c0_25, %c0_26, %c0_27] : memref<1x8x1xf32, #tpu.memory_space<vmem>>, vector<1x8x1xf32>
      tpu.vector_store %arg6[%c0_25, %c0_26, %c0_27], %27 {strides = array<i32>} : memref<1x8x1xf32, #tpu.memory_space<vmem>>, vector<1x8x1xf32>,
      %cst_28 = arith.constant 0.000000e+00 : f32
      %29 = vector.broadcast %cst_28 : f32 to vector<1x8x1xf32>
      %c0_29 = arith.constant 0 : index
      %c0_30 = arith.constant 0 : index
      %c0_31 = arith.constant 0 : index
      %30 = vector.load %arg7[%c0_29, %c0_30, %c0_31] : memref<1x8x1xf32, #tpu.memory_space<vmem>>, vector<1x8x1xf32>
      tpu.vector_store %arg7[%c0_29, %c0_30, %c0_31], %29 {strides = array<i32>} : memref<1x8x1xf32, #tpu.memory_space<vmem>>, vector<1x8x1xf32>,
    } else {
    }
    %c0_10 = arith.constant 0 : index
    %c0_11 = arith.constant 0 : index
    %c0_12 = arith.constant 0 : index
    %14 = vector.load %arg6[%c0_10, %c0_11, %c0_12] : memref<1x8x1xf32, #tpu.memory_space<vmem>>, vector<1x8x1xf32>
    %cst_13 = arith.constant dense<0.000000e+00> : vector<8xf32>
    %15 = vector.multi_reduction <add>, %6, %cst_13 [1] : vector<8x256xf32> to vector<8xf32>
    %16 = vector.shape_cast %15 : vector<8xf32> to vector<8x1xf32>
    %17 = vector.shape_cast %16 : vector<8x1xf32> to vector<1x8x1xf32>
    %18 = arith.addf %14, %17 : vector<1x8x1xf32>
    %c0_14 = arith.constant 0 : index
    %c0_15 = arith.constant 0 : index
    %c0_16 = arith.constant 0 : index
    %19 = vector.load %arg6[%c0_14, %c0_15, %c0_16] : memref<1x8x1xf32, #tpu.memory_space<vmem>>, vector<1x8x1xf32>
    tpu.vector_store %arg6[%c0_14, %c0_15, %c0_16], %18 {strides = array<i32>} : memref<1x8x1xf32, #tpu.memory_space<vmem>>, vector<1x8x1xf32>,
    %c0_17 = arith.constant 0 : index
    %c0_18 = arith.constant 0 : index
    %c0_19 = arith.constant 0 : index
    %20 = vector.load %arg7[%c0_17, %c0_18, %c0_19] : memref<1x8x1xf32, #tpu.memory_space<vmem>>, vector<1x8x1xf32>
    %21 = arith.mulf %6, %6 : vector<8x256xf32>
    %cst_20 = arith.constant dense<0.000000e+00> : vector<8xf32>
    %22 = vector.multi_reduction <add>, %21, %cst_20 [1] : vector<8x256xf32> to vector<8xf32>
    %23 = vector.shape_cast %22 : vector<8xf32> to vector<8x1xf32>
    %24 = vector.shape_cast %23 : vector<8x1xf32> to vector<1x8x1xf32>
    %25 = arith.addf %20, %24 : vector<1x8x1xf32>
    %c0_21 = arith.constant 0 : index
    %c0_22 = arith.constant 0 : index
    %c0_23 = arith.constant 0 : index
    %26 = vector.load %arg7[%c0_21, %c0_22, %c0_23] : memref<1x8x1xf32, #tpu.memory_space<vmem>>, vector<1x8x1xf32>
    tpu.vector_store %arg7[%c0_21, %c0_22, %c0_23], %25 {strides = array<i32>} : memref<1x8x1xf32, #tpu.memory_space<vmem>>, vector<1x8x1xf32>,
    return
  }
  func.func @transform_0(%arg0: i32, %arg1: i32) -> (i32, i32, i32) {
    %c0_i32 = arith.constant 0 : i32
    %c0_i32_0 = arith.constant 0 : i32
    return %arg0, %c0_i32, %arg1 : i32, i32, i32
  }
  func.func @transform_1(%arg0: i32, %arg1: i32) -> (i32, i32) {
    %c0_i32 = arith.constant 0 : i32
    %c0_i32_0 = arith.constant 0 : i32
    %c0_i32_1 = arith.constant 0 : i32
    return %c0_i32, %c0_i32_0 : i32, i32
  }
  func.func @transform_2(%arg0: i32, %arg1: i32) -> (i32, i32) {
    %c0_i32 = arith.constant 0 : i32
    %c0_i32_0 = arith.constant 0 : i32
    %c0_i32_1 = arith.constant 0 : i32
    return %c0_i32, %c0_i32_0 : i32, i32
  }
  func.func @transform_3(%arg0: i32, %arg1: i32) -> (i32, i32, i32) {
    %c0_i32 = arith.constant 0 : i32
    %c0_i32_0 = arith.constant 0 : i32
    return %arg0, %c0_i32, %arg1 : i32, i32, i32
  }
  func.func @transform_4(%arg0: i32, %arg1: i32) -> (i32, i32, i32) {
    %c0_i32 = arith.constant 0 : i32
    %c0_i32_0 = arith.constant 0 : i32
    %c0_i32_1 = arith.constant 0 : i32
    return %arg0, %c0_i32, %c0_i32_0 : i32, i32, i32
  }
  func.func @transform_5(%arg0: i32, %arg1: i32) -> (i32, i32, i32) {
    %c0_i32 = arith.constant 0 : i32
    %c0_i32_0 = arith.constant 0 : i32
    %c0_i32_1 = arith.constant 0 : i32
    return %arg0, %c0_i32, %c0_i32_0 : i32, i32, i32
  }
}

module attributes {stable_mosaic.version = 11 : i64} {
  func.func @_affine_lif_kernel(%arg0: i32, %arg1: i32, %arg2: memref<1x8x256xbf16, #tpu.memory_space<vmem>>, %arg3: memref<8x1xf32, #tpu.memory_space<vmem>>, %arg4: memref<8x1xf32, #tpu.memory_space<vmem>>, %arg5: memref<8x1xf32, #tpu.memory_space<vmem>>, %arg6: memref<1x8x256xf32, #tpu.memory_space<vmem>>, %arg7: memref<1x8x256xf32, #tpu.memory_space<vmem>>, %arg8: memref<1x8x256xbf16, #tpu.memory_space<vmem>>, %arg9: memref<1x8x256xf32, #tpu.memory_space<vmem>>, %arg10: memref<1x8x256xf32, #tpu.memory_space<vmem>>) attributes {dimension_semantics = [#tpu.dimension_semantics<parallel>, #tpu.dimension_semantics<parallel>], iteration_bounds = array<i64: 2, 1>, scalar_prefetch = 0 : i64, scratch_operands = 0 : i64, tpu.core_type = #tpu.core_type<tc>, window_params = [{transform_indices = @transform_0, window_bounds = array<i64: 1, 8, 256>}, {pipeline_mode = #tpu.pipeline_mode<synchronous>, transform_indices = @transform_1, window_bounds = array<i64: 8, 1>}, {pipeline_mode = #tpu.pipeline_mode<synchronous>, transform_indices = @transform_2, window_bounds = array<i64: 8, 1>}, {pipeline_mode = #tpu.pipeline_mode<synchronous>, transform_indices = @transform_3, window_bounds = array<i64: 8, 1>}, {transform_indices = @transform_4, window_bounds = array<i64: 1, 8, 256>}, {transform_indices = @transform_5, window_bounds = array<i64: 1, 8, 256>}, {transform_indices = @transform_6, window_bounds = array<i64: 1, 8, 256>}, {transform_indices = @transform_7, window_bounds = array<i64: 1, 8, 256>}, {transform_indices = @transform_8, window_bounds = array<i64: 1, 8, 256>}]} {
    %c0 = arith.constant 0 : index
    %c0_0 = arith.constant 0 : index
    %0 = vector.load %arg3[%c0, %c0_0] : memref<8x1xf32, #tpu.memory_space<vmem>>, vector<8x1xf32>
    %c0_1 = arith.constant 0 : index
    %c0_2 = arith.constant 0 : index
    %c0_3 = arith.constant 0 : index
    %1 = vector.load %arg2[%c0_1, %c0_2, %c0_3] : memref<1x8x256xbf16, #tpu.memory_space<vmem>>, vector<1x8x256xbf16>
    %2 = vector.shape_cast %1 : vector<1x8x256xbf16> to vector<8x256xbf16>
    %3 = arith.extf %2 : vector<8x256xbf16> to vector<8x256xf32>
    %4 = vector.broadcast %0 : vector<8x1xf32> to vector<8x256xf32>
    %5 = arith.mulf %4, %3 : vector<8x256xf32>
    %c0_4 = arith.constant 0 : index
    %c0_5 = arith.constant 0 : index
    %6 = vector.load %arg4[%c0_4, %c0_5] : memref<8x1xf32, #tpu.memory_space<vmem>>, vector<8x1xf32>
    %7 = vector.broadcast %6 : vector<8x1xf32> to vector<8x256xf32>
    %8 = arith.addf %5, %7 : vector<8x256xf32>
    %c0_6 = arith.constant 0 : index
    %c0_7 = arith.constant 0 : index
    %9 = vector.load %arg5[%c0_6, %c0_7] : memref<8x1xf32, #tpu.memory_space<vmem>>, vector<8x1xf32>
    %c0_8 = arith.constant 0 : index
    %c0_9 = arith.constant 0 : index
    %c0_10 = arith.constant 0 : index
    %10 = vector.load %arg6[%c0_8, %c0_9, %c0_10] : memref<1x8x256xf32, #tpu.memory_space<vmem>>, vector<1x8x256xf32>
    %11 = vector.shape_cast %10 : vector<1x8x256xf32> to vector<8x256xf32>
    %c0_11 = arith.constant 0 : index
    %c0_12 = arith.constant 0 : index
    %c0_13 = arith.constant 0 : index
    %12 = vector.load %arg7[%c0_11, %c0_12, %c0_13] : memref<1x8x256xf32, #tpu.memory_space<vmem>>, vector<1x8x256xf32>
    %13 = vector.shape_cast %12 : vector<1x8x256xf32> to vector<8x256xf32>
    %cst = arith.constant 7.000000e-02 : f32
    %14 = vector.broadcast %cst : f32 to vector<8x256xf32>
    %15 = arith.mulf %14, %13 : vector<8x256xf32>
    %cst_14 = arith.constant 3.000000e-01 : f32
    %16 = vector.broadcast %cst_14 : f32 to vector<8x256xf32>
    %17 = arith.addf %16, %15 : vector<8x256xf32>
    %18 = arith.addf %11, %8 : vector<8x256xf32>
    %19 = arith.cmpf ogt, %18, %17 : vector<8x256xf32>
    %20 = arith.extui %19 : vector<8x256xi1> to vector<8x256xi32>
    %21 = arith.sitofp %20 : vector<8x256xi32> to vector<8x256xf32>
    %cst_15 = arith.constant 1.000000e+00 : f32
    %22 = vector.broadcast %cst_15 : f32 to vector<8x256xf32>
    %23 = arith.subf %22, %21 : vector<8x256xf32>
    %cst_16 = arith.constant 2.000000e-01 : f32
    %24 = vector.broadcast %cst_16 : f32 to vector<8x256xf32>
    %25 = arith.mulf %24, %23 : vector<8x256xf32>
    %26 = arith.mulf %18, %25 : vector<8x256xf32>
    %27 = vector.broadcast %9 : vector<8x1xf32> to vector<8x256xf32>
    %28 = arith.mulf %27, %13 : vector<8x256xf32>
    %29 = arith.subf %28, %21 : vector<8x256xf32>
    %30 = arith.truncf %21 : vector<8x256xf32> to vector<8x256xbf16>
    %c0_17 = arith.constant 0 : index
    %c0_18 = arith.constant 0 : index
    %c0_19 = arith.constant 0 : index
    %31 = vector.load %arg8[%c0_17, %c0_18, %c0_19] : memref<1x8x256xbf16, #tpu.memory_space<vmem>>, vector<1x8x256xbf16>
    %32 = vector.shape_cast %31 : vector<1x8x256xbf16> to vector<8x256xbf16>
    %33 = vector.shape_cast %30 : vector<8x256xbf16> to vector<1x8x256xbf16>
    tpu.vector_store %arg8[%c0_17, %c0_18, %c0_19], %33 {strides = array<i32>} : memref<1x8x256xbf16, #tpu.memory_space<vmem>>, vector<1x8x256xbf16>,
    %c0_20 = arith.constant 0 : index
    %c0_21 = arith.constant 0 : index
    %c0_22 = arith.constant 0 : index
    %34 = vector.load %arg9[%c0_20, %c0_21, %c0_22] : memref<1x8x256xf32, #tpu.memory_space<vmem>>, vector<1x8x256xf32>
    %35 = vector.shape_cast %34 : vector<1x8x256xf32> to vector<8x256xf32>
    %36 = vector.shape_cast %26 : vector<8x256xf32> to vector<1x8x256xf32>
    tpu.vector_store %arg9[%c0_20, %c0_21, %c0_22], %36 {strides = array<i32>} : memref<1x8x256xf32, #tpu.memory_space<vmem>>, vector<1x8x256xf32>,
    %c0_23 = arith.constant 0 : index
    %c0_24 = arith.constant 0 : index
    %c0_25 = arith.constant 0 : index
    %37 = vector.load %arg10[%c0_23, %c0_24, %c0_25] : memref<1x8x256xf32, #tpu.memory_space<vmem>>, vector<1x8x256xf32>
    %38 = vector.shape_cast %37 : vector<1x8x256xf32> to vector<8x256xf32>
    %39 = vector.shape_cast %29 : vector<8x256xf32> to vector<1x8x256xf32>
    tpu.vector_store %arg10[%c0_23, %c0_24, %c0_25], %39 {strides = array<i32>} : memref<1x8x256xf32, #tpu.memory_space<vmem>>, vector<1x8x256xf32>,
    return
  }
  func.func @transform_0(%arg0: i32, %arg1: i32) -> (i32, i32, i32) {
    %c0_i32 = arith.constant 0 : i32
    %c0_i32_0 = arith.constant 0 : i32
    return %arg0, %c0_i32, %arg1 : i32, i32, i32
  }
  func.func @transform_1(%arg0: i32, %arg1: i32) -> (i32, i32) {
    %c0_i32 = arith.constant 0 : i32
    %c0_i32_0 = arith.constant 0 : i32
    %c0_i32_1 = arith.constant 0 : i32
    return %c0_i32, %c0_i32_0 : i32, i32
  }
  func.func @transform_2(%arg0: i32, %arg1: i32) -> (i32, i32) {
    %c0_i32 = arith.constant 0 : i32
    %c0_i32_0 = arith.constant 0 : i32
    %c0_i32_1 = arith.constant 0 : i32
    return %c0_i32, %c0_i32_0 : i32, i32
  }
  func.func @transform_3(%arg0: i32, %arg1: i32) -> (i32, i32) {
    %c0_i32 = arith.constant 0 : i32
    %c0_i32_0 = arith.constant 0 : i32
    %c0_i32_1 = arith.constant 0 : i32
    return %c0_i32, %c0_i32_0 : i32, i32
  }
  func.func @transform_4(%arg0: i32, %arg1: i32) -> (i32, i32, i32) {
    %c0_i32 = arith.constant 0 : i32
    %c0_i32_0 = arith.constant 0 : i32
    return %arg0, %c0_i32, %arg1 : i32, i32, i32
  }
  func.func @transform_5(%arg0: i32, %arg1: i32) -> (i32, i32, i32) {
    %c0_i32 = arith.constant 0 : i32
    %c0_i32_0 = arith.constant 0 : i32
    return %arg0, %c0_i32, %arg1 : i32, i32, i32
  }
  func.func @transform_6(%arg0: i32, %arg1: i32) -> (i32, i32, i32) {
    %c0_i32 = arith.constant 0 : i32
    %c0_i32_0 = arith.constant 0 : i32
    return %arg0, %c0_i32, %arg1 : i32, i32, i32
  }
  func.func @transform_7(%arg0: i32, %arg1: i32) -> (i32, i32, i32) {
    %c0_i32 = arith.constant 0 : i32
    %c0_i32_0 = arith.constant 0 : i32
    return %arg0, %c0_i32, %arg1 : i32, i32, i32
  }
  func.func @transform_8(%arg0: i32, %arg1: i32) -> (i32, i32, i32) {
    %c0_i32 = arith.constant 0 : i32
    %c0_i32_0 = arith.constant 0 : i32
    return %arg0, %c0_i32, %arg1 : i32, i32, i32
  }
}

</mosaic_0001>

<bundles_post_ra>
// kernel: _snn_step_impl.2
= control target key start
LH: loop header
LB: loop body
LE: loop exit
PB: predicated region body
PF: predicated region fallthrough
CT: control target
= control target key end

     0   :  { %s652_s18 = smov 0   ;;  %s654_s19 = smov 0   ;;  %s705_s0 = inlined_call_operand.vmem [shape: bf16[2,36,256], index: 0, kind: input, shape index: {}]   ;;  %s706_s1 = inlined_call_operand.vmem [shape: bf16[8,36], index: 1, kind: input, shape index: {}]   ;;  %s707_s2 = inlined_call_operand.vmem [shape: f32[8,1], index: 2, kind: input, shape index: {}]   ;;  %s708_s3 = inlined_call_operand.vmem [shape: bf16[2,8,256], index: 3, kind: output, shape index: {0}]   ;;  %s709_s4 = inlined_call_operand.vmem [shape: f32[2,8,1], index: 4, kind: output, shape index: {1}]   ;;  %s710_s5 = inlined_call_operand.vmem [shape: f32[2,8,1], index: 5, kind: output, shape index: {2}]  }
   0x1   :  { %s656_s20 = smov 0  }
   0x2 LB: > { %s28_s21 = sadd.s32 1, %s614_s19  ;;  %p537_p0 = scmp.ge.s32.totalorder %s618_s20, 1  ;;  %s618_s20 = sphi %s656_s20, %s16_s20   ;;  %s614_s19 = sphi %s654_s19, %s712_s19   ;;  %s610_s18 = sphi %s652_s18, %s711_s18  }
   0x3   : > { %p30_p1 = scmp.ge.s32.totalorder %s28_s21, 2  ;;  %p213_p2 = scmp.lt.s32.totalorder %s618_s20, 3 }
   0x5   : > { %s714_s21 = smov (%p30_p1, %s28_s21), 0  ;;  %p214_p3 = pnand %p537_p0, %p213_p2 }
   0x6   : > { %p258_p4 = scmp.lt.s32.totalorder (!%p214_p3), %s610_s18, 1 }
   0x7   : > { %217 = sbr.rel (%p214_p3) target bundleno = 284 (0x11c), region = 32 }
   0xc   : > { %v620_v0 = vmov 0   ;;  %v292_v1 = vld [vmem:[%s707_s2] sm:$0xff]  ;;  %s716_s18 = smov (!%p258_p4, %s610_s18), 1  ;;  %vm327_vm0 = vcmask 1041408   ;;  %vm323_vm1 = vcmask 293888   ;;  %vm366_vm2 = vcmask 7168  }
   0xd   : > { %595 = vset.pattern.permute.xlu0 %v620_v0  ;;  %s568_s24 = smul.u32 40, %s716_s18  ;;  %v286_v21 = vld [vmem:[%s706_s1] sm:$0xf]  ;;  %s563_s30 = sshll.u32 %s716_s18, 3  ;;  %v621_v22 = vmov 0.0  }
   0xe   : > { %295 = vperm.xlu0 %595, %v292_v1   ;;  %s280_s8 = scalar_lea.vmem %s709_s4, %s563_s30  ;;  %s284_s11 = scalar_lea.vmem %s710_s5, %s563_s30 }
   0xf   : > { %s265_s27 = scalar_lea.vmem %s705_s0, %s568_s24  ;;  %367 = vst.msk [vmem:[%s280_s8] sm:$0xff] %vm366_vm2, %v621_v22  ;;  %s275_s14 = scalar_lea.vmem %s708_s3, %s563_s30 }
  0x10   : > { %v291_v2 = vld [vmem:[%s265_s27 + $0x20] sm:$0x33]  ;;  %v553_v5 = vld [vmem:[%s265_s27 + $0x10] sm:$0xf]  ;;  %v567_v8 = vld [vmem:[%s265_s27 + $0x14] sm:$0xf0] }
  0x11   : > { %v311_v3 = vunpack.c.l.b16 %v291_v2  ;;  %v312_v4 = vunpack.c.h.b16 %v291_v2  ;;  %v566_v9 = vld [vmem:[%s265_s27 + $0x14] sm:$0xf]  ;;  %v555_v10 = vld [vmem:[%s265_s27 + $0x18] sm:$0xf0]  ;;  %v554_v13 = vor.u32 %v567_v8, %v553_v5  ;;  %v545_v15 = vld [vmem:[%s265_s27] sm:$0xf] }
  0x12   : > { %v558_v14 = vor.u32 %v566_v9, %v555_v10  ;;  %v565_v16 = vld [vmem:[%s265_s27 + $0x4] sm:$0xf0]  ;;  %v564_v17 = vld [vmem:[%s265_s27 + $0x4] sm:$0xf]  ;;  %v547_v18 = vld [vmem:[%s265_s27 + $0x8] sm:$0xf0] }
  0x13   : > { %v317_v6 = vpack.c.b16 %v311_v3, %v311_v3  ;;  %v318_v7 = vpack.c.b16 %v312_v4, %v312_v4  ;;  %v546_v19 = vor.u32 %v565_v16, %v545_v15  ;;  %v550_v20 = vor.u32 %v564_v17, %v547_v18  ;;  %368 = vst.msk [vmem:[%s284_s11] sm:$0xff] %vm366_vm2, %v621_v22 }
  0x15   : > { %v329_v11 = vsel %vm327_vm0, %v317_v6, 0  ;;  %v332_v12 = vsel %vm327_vm0, %v318_v7, 0 }
  0x16   : > { %339 = vmatpush.bf16.msra.mxu0 %v329_v11  ;;  %352 = vmatpush.bf16.msra.mxu1 %v332_v12  ;;  %v369_v35 = vld [vmem:[%s280_s8] sm:$0xff] }
  0x1a   : > { %340 = vmatpush.bf16.msra.mxu0 %v554_v13  ;;  %353 = vmatpush.bf16.msra.mxu1 %v558_v14  ;;  %v376_v37 = vld [vmem:[%s284_s11] sm:$0xff] }
  0x1e   : > { %341 = vmatpush.bf16.msra.mxu0 %v546_v19  ;;  %354 = vmatpush.bf16.msra.mxu1 %v550_v20 }
  0x21   : > { %559 = vmatmul.msk.bf16.vlgmr.msra.gmra.mxu0 %vm323_vm1, %v286_v21  ;;  %560 = vmatmul.msk.bf16.vlgmr.msra.gmra.mxu1 %vm323_vm1, %v286_v21 }
  0x80   : > { %v296_v23 = vpop.permute.xlu0 %295 }
  0x9e   : > { %v343_v24 = vpop.f32.mrf.mxu0  ;;  %v356_v25 = vpop.f32.mrf.mxu1 }
  0x9f   : > { %v344_v26 = vadd.f32 %v343_v24, %v296_v23  ;;  %v357_v27 = vadd.f32 %v356_v25, %v296_v23 }
  0xa1   : > { %v360_v28 = vpack.c.bf16 %v357_v27, %v344_v26  ;;  %v370_v29 = vadd.f32 %v357_v27, %v344_v26  ;;  %v377_v30 = vmul.f32 %v344_v26, %v344_v26  ;;  %v378_v31 = vmul.f32 %v357_v27, %v357_v27 }
  0xa3   : > { %371 = vadd.xlane.f32.xlu0 %v370_v29  ;;  %v379_v32 = vadd.f32 %v378_v31, %v377_v30  ;;  %361 = vst [vmem:[%s275_s14] sm:$0xff] %v360_v28 }
  0xa5   : > { %380 = vadd.xlane.f32.xlu1 %v379_v32 }
  0xa6   : > { %v345_v33 = vpop.f32.mrf.mxu0  ;;  %v358_v34 = vpop.f32.mrf.mxu1 }
 0x116   : > { %v372_v36 = vpop.xlane.xlu0 %371 }
 0x117   : > { %v373_v38 = vadd.f32 %v372_v36, %v369_v35 }
 0x118   : > { %v381_v39 = vpop.xlane.xlu1 %380 }
 0x119   : > { %375 = vst.msk [vmem:[%s280_s8] sm:$0xff] %vm366_vm2, %v373_v38  ;;  %v382_v40 = vadd.f32 %v381_v39, %v376_v37 }
 0x11b   : > { %383 = vst.msk [vmem:[%s284_s11] sm:$0xff] %vm366_vm2, %v382_v40 }
 0x11c PF: > { %s16_s20 = sadd.s32 1, %s618_s20   ;;  %s711_s18 = smov %s614_s19 }
 0x11d   : > { %p13_p5 = scmp.ge.s32.totalorder %s16_s20, 4   ;;  %s712_s19 = smov %s714_s21 }
 0x11f   :  { %15 = sbr.rel (!%p13_p5) target bundleno = 2 (0x2), region = 90 }

// kernel: _snn_step_impl.3
= control target key start
LH: loop header
LB: loop body
LE: loop exit
PB: predicated region body
PF: predicated region fallthrough
CT: control target
= control target key end

     0   :  { %s1091_s0 = inlined_call_operand.vmem [shape: bf16[2,8,256], index: 0, kind: input, shape index: {}]   ;;  %s1092_s1 = inlined_call_operand.vmem [shape: f32[8,1], index: 1, kind: input, shape index: {}]   ;;  %s1093_s2 = inlined_call_operand.vmem [shape: f32[8,1], index: 2, kind: input, shape index: {}]   ;;  %s1094_s3 = inlined_call_operand.vmem [shape: f32[8,1], index: 3, kind: input, shape index: {}]   ;;  %s1095_s4 = inlined_call_operand.vmem [shape: f32[2,8,256], index: 4, kind: input, shape index: {}, may-alias: {4,7}]   ;;  %s1096_s5 = inlined_call_operand.vmem [shape: f32[2,8,256], index: 5, kind: input, shape index: {}, may-alias: {5,8}]   ;;  %s1097_s6 = inlined_call_operand.hbm [shape: bf16[2,8,256], index: 6, kind: output, shape index: {0}]   ;;  %s1098_s7 = inlined_call_operand.vmem [shape: f32[2,8,256], index: 7, kind: output, shape index: {1}, may-alias: {4,7}]   ;;  %s1099_s8 = inlined_call_operand.vmem [shape: f32[2,8,256], index: 8, kind: output, shape index: {2}, may-alias: {5,8}]  }
   0x1   :  { %1100 = sst [smem:[#allocation5_spill]] %s1091_s0 }
   0x2   :  { %1101 = sst [smem:[#allocation6_spill]] %s1092_s1 }
   0x3   :  { %1102 = sst [smem:[#allocation7_spill]] %s1093_s2 }
   0x4   :  { %14 = vsyncpa [#allocation3], 0 }
   0x5   :  { %16 = vsyncpa [#allocation3 + $0x1], 0  ;;  %s957_s27 = smov 0   ;;  %s959_s28 = smov 0  }
   0x6   :  { %s961_s29 = smov 0   ;;  %s963_s30 = smov 0  }
   0x7   :  { %s965_s9 = smov 0   ;;  %s967_s10 = smov 0  }
   0x8 LB: > { %s742_s11 = sadd.s32 4294967295, %s908_s10   ;;  %s743_s12 = sadd.s32 4294967294, %s908_s10   ;;  %s908_s10 = sphi %s967_s10, %s22_s10   ;;  %s904_s9 = sphi %s965_s9, %s1112_s9   ;;  %s900_s30 = sphi %s963_s30, %s1111_s30   ;;  %s896_s29 = sphi %s961_s29, %s1110_s29   ;;  %s892_s28 = sphi %s959_s28, %s1109_s28   ;;  %s888_s27 = sphi %s957_s27, %s1108_s27  }
   0x9   : > { %s34_s13 = sadd.s32 1, %s904_s9  ;;  %s190_s14 = sadd.s32 1, %s896_s29 }
   0xa   : > { %p36_p0 = scmp.ge.s32.totalorder %s34_s13, 2  ;;  %p200_p1 = scmp.ne.s32.totalorder %s896_s29, %s892_s28 }
   0xb   : > { %p201_p2 = scmp.eq.s32.totalorder %s742_s11, 1  ;;  %p206_p3 = scmp.ne.s32.totalorder %s892_s28, %s888_s27 }
   0xc   : > { %s1114_s13 = smov (%p36_p0, %s34_s13), 0  ;;  %p207_p5 = scmp.eq.s32.totalorder %s743_s12, 1 }
   0xd   : > { %p997_p4 = por %p201_p2, %p200_p1  ;;  %s185_s16 = ssub.s32 %s904_s9, %s1114_s13 }
   0xe   : > { %p746_p6 = scmp.ge.s32.totalorder %s908_s10, 1  ;;  %p188_p7 = scmp.eq.s32.totalorder %s185_s16, 0 }
   0xf   : > { %p1004_p8 = por %p207_p5, %p206_p3  ;;  %p329_p9 = scmp.lt.s32.totalorder %s908_s10, 3 }
  0x10   : > { %s1010_s18 = scalar_select %p188_p7, %s896_s29, %s190_s14  }
  0x11   : > { %p330_p10 = pnand %p746_p6, %p329_p9 }
  0x12   : > { %s1105_s1 = sld [smem:[#allocation6_spill]] (!%p330_p10)  ;;  %p404_p11 = scmp.lt.s32.totalorder (!%p330_p10), %s900_s30, 1 }
  0x13   : > { %333 = sbr.rel (%p330_p10) target bundleno = 163 (0xa3), region = 44  ;;  %s1106_s2 = sld [smem:[#allocation7_spill]] (!%p330_p10) }
  0x14   : > { %s1107_s0 = sld [smem:[#allocation5_spill]] (!%p330_p10) }
  0x18   : > { %v454_v0 = vld [vmem:[%s1105_s1] sm:$0xff]  ;;  %v910_v2 = vmov 0   ;;  %s405_s25 = scalar_select %p404_p11, %s900_s30, 1  ;;  %v911_v26 = vmov 0.0  }
  0x19   : > { %v473_v1 = vld [vmem:[%s1094_s3] sm:$0xff]  ;;  %828 = vset.pattern.permute.xlu0 %v910_v2  ;;  %829 = vset.pattern.permute.xlu1 %v910_v2  ;;  %s850_s1 = scalar_lea.hbm %s1097_s6, 16 }
  0x1a   : > { %460 = vperm.xlu0 %828, %v454_v0   ;;  %498 = vperm.xlu1 %829, %v473_v1   ;;  %v465_v3 = vld [vmem:[%s1106_s2] sm:$0xff]  ;;  %s765_s26 = sshll.u32 %s405_s25, 3  ;;  %s1023_s11 = sshll.u32 %s405_s25, 4 }
  0x1b   : > { %s411_s16 = scalar_lea.vmem %s1107_s0, %s765_s26  ;;  %s431_s21 = scalar_lea.vmem %s1096_s5, %s1023_s11 }
  0x1c   : > { %v455_v5 = vld [vmem:[%s411_s16] sm:$0xff]  ;;  %v477_v7 = vld [vmem:[%s431_s21 + $0x8] sm:$0xff]  ;;  %s421_s24 = scalar_lea.vmem %s1095_s4, %s1023_s11  ;;  %s378_s25 = sand.u32 1, %s892_s28  }
  0x1d   : > { %v476_v6 = vld [vmem:[%s431_s21] sm:$0xff]  ;;  %v456_v8 = vunpack.c.l.bf16 %v455_v5  ;;  %v457_v9 = vunpack.c.h.bf16 %v455_v5  ;;  %v479_v11 = vmul.f32 0.07, %v477_v7  ;;  %v475_v16 = vld [vmem:[%s421_s24 + $0x8] sm:$0xff]  ;;  %s770_s26 = sshll.u32 %s900_s30, 3  ;;  %s1040_s12 = sshll.u32 %s378_s25, 3 }
  0x1e   : > { %v478_v10 = vmul.f32 0.07, %v476_v6  ;;  %v474_v15 = vld [vmem:[%s421_s24] sm:$0xff]  ;;  %s543_s19 = scalar_lea.hbm %s1097_s6, %s770_s26  ;;  %s452_s30 = scalar_lea.vmem %s1099_s8, %s1023_s11 }
  0x1f   : > { %v481_v21 = vadd.f32 0.3, %v479_v11  ;;  %s380_s22 = scalar_lea.vmem [#allocation2], %s1040_s12  ;;  %s547_s24 = sshll.u32 %s543_s19, 4  ;;  %s548_s24 = int_to_ptr.hbm [resolvable:$true] %s547_s24 }
  0x20   : > { %v480_v20 = vadd.f32 0.3, %v478_v10  ;;  %s1050_s23 = sshll.u32 %s380_s22, 4  ;;  %s442_s12 = scalar_lea.vmem %s1098_s7, %s1023_s11  ;;  %s546_s23 = int_to_ptr.vmem [resolvable:$true] %s1050_s23 }
  0x21   : > { %s512_s16 = scalar_lea.sflag [#allocation3], %s378_s25  ;;  %s844_s19 = sshra.s32 %s548_s24, 4  ;;  %s845_s19 = int_to_ptr.hbm [resolvable:$true] %s844_s19 }
  0x22   : > { %468 = vperm.xlu0 %828, %v465_v3   ;;  %s846_s20 = scalar_lea.hbm %s845_s19, 8  ;;  %p851_p1 = scmp.lt.s32.totalorder %s845_s19, %s1097_s6 }
  0x23   : > { %p847_p12 = scmp.ne.s32.totalorder %s845_s19, %s846_s20  ;;  %p852_p2 = scmp.lt.s32.totalorder %s850_s1, %s846_s20 }
  0x25   : > { %p848_p13 = pnand %p847_p12, %p997_p4  ;;  %p853_p3 = por %p852_p2, %p851_p1 }
  0x27   : > { %p849_p0 = pneg %p848_p13 }
  0x29   : > { %p854_p5 = pnand %p853_p3, %p849_p0 }
  0x8c   : > { %v461_v4 = vpop.permute.xlu0 %460  ;;  %v499_v17 = vpop.permute.xlu1 %498 }
  0x8d   : > { %v463_v12 = vmul.f32 %v461_v4, %v456_v8  ;;  %v464_v13 = vmul.f32 %v461_v4, %v457_v9  ;;  %v501_v24 = vmul.f32 %v499_v17, %v476_v6  ;;  %v502_v25 = vmul.f32 %v499_v17, %v477_v7 }
  0x94   : > { %v469_v14 = vpop.permute.xlu0 %468 }
  0x95   : > { %v471_v18 = vadd.f32 %v469_v14, %v463_v12  ;;  %v472_v19 = vadd.f32 %v469_v14, %v464_v13 }
  0x97   : > { %v482_v22 = vadd.f32 %v474_v15, %v471_v18  ;;  %v483_v23 = vadd.f32 %v475_v16, %v472_v19 }
  0x99   : > { %vm484_vm0 = vcmp.gt.f32.partialorder %v482_v22, %v480_v20  ;;  %vm485_vm1 = vcmp.gt.f32.partialorder %v483_v23, %v481_v21 }
  0x9a   : > { %v758_v27 = vsel %vm484_vm0, 1.0, %v911_v26  ;;  %v759_v28 = vsel %vm485_vm1, 1.0, %v911_v26 }
  0x9b   : > { %v490_v29 = vsub.f32 1.0, %v758_v27  ;;  %v491_v30 = vsub.f32 1.0, %v759_v28  ;;  %v503_v31 = vsub.f32 %v501_v24, %v758_v27  ;;  %v504_v32 = vsub.f32 %v502_v25, %v759_v28 }
  0x9c   : > { %v505_v33 = vpack.c.bf16 %v759_v28, %v758_v27 }
  0x9d   : > { %v492_v34 = vmul.f32 0.2, %v490_v29  ;;  %v493_v35 = vmul.f32 0.2, %v491_v30  ;;  %509 = vst [vmem:[%s452_s30] sm:$0xff] %v503_v31 }
  0x9e   : > { %510 = vst [vmem:[%s452_s30 + $0x8] sm:$0xff] %v504_v32 }
  0x9f   : > { %v494_v36 = vmul.f32 %v492_v34, %v482_v22  ;;  %v495_v37 = vmul.f32 %v493_v35, %v483_v23  ;;  %506 = vst [vmem:[%s380_s22] sm:$0xff] %v505_v33 }
  0xa0   : > { %857 = shalt.err (!%p854_p5)
}
  0xa1   : > { %771 = dma.vmem_to_hbm [thread:$0]  (%p997_p4), %s546_s23, 128, %s548_s24, %s512_s16   ;;  %507 = vst [vmem:[%s442_s12] sm:$0xff] %v494_v36 }
  0xa2   : > { %508 = vst [vmem:[%s442_s12 + $0x8] sm:$0xff] %v495_v37 }
  0xa3 PF: > { %p777_p6 = scmp.ge.s32.totalorder %s908_s10, 2  ;;  %s567_s0 = sand.u32 1, %s888_s27  }
  0xa4   : > { %s568_s2 = scalar_lea.sflag [#allocation3], %s567_s0 }
  0xa5   : > { %p774_p7 = pnand %p777_p6, %p1004_p8 }
  0xa7   : > { %p775_p9 = pneg %p774_p7 }
  0xa9   : > { %883 = dma.done.wait (%p775_p9), %s568_s2, 128  }
  0xaa   : > { %885 = vsyncadd (%p775_p9), %s568_s2, 4294967168  ;;  %s22_s10 = sadd.s32 1, %s908_s10   ;;  %s1108_s27 = smov %s892_s28 }
  0xab   : > { %p19_p10 = scmp.ge.s32.totalorder %s22_s10, 4   ;;  %s1109_s28 = smov %s896_s29 }
  0xac   : > { %s1110_s29 = smov %s1010_s18  ;;  %s1111_s30 = smov %s904_s9 }
  0xad   : > { %s1112_s9 = smov %s1114_s13  ;;  %21 = sbr.rel (!%p19_p10) target bundleno = 8 (0x8), region = 109 }
  0xb2   :  { %598 = vsyncpa [#allocation3], 1 }
  0xb3   :  { %600 = vsyncpa [#allocation3 + $0x1], 1 }

</bundles_post_ra>
